<compile_context>
chip_gen: v5e
topology: v5e:2x2
jax: 0.10.0
libtpu: 0.0.40
codegen_flags: <defaults>
</compile_context>

<pallas_src>
import jax
import jax.numpy as jnp
from jax.experimental import pallas as pl
from jax.experimental.pallas import tpu as pltpu


def _round_up(x, m):
    return ((x + m - 1) // m) * m


def _vmem_capacity_bytes():
    try:
        return int(pltpu.get_tpu_info().vmem_capacity_bytes)
    except Exception:
        return 64 << 20              # conservative (v7x per-core VMEM)


# ---------------------------------------------------------------------------
# Kernels.  Grid = (row_tiles, K); rows are "parallel", K is "arbitrary".
# acc_ref is a persistent VMEM f32 scratch holding max_k of the neighbour
# matmul; bias/ReLU (and the center matmul on the fast path) run at k == K-1.
# ---------------------------------------------------------------------------
def _edge_conv_center_kernel(xc_ref, xj_ref, wa_ref, wb_ref, b_ref, o_ref,
                             acc_ref):
    """Fast path (centers constant over K).

    xc_ref : (TM, C)     center features (same block for every k)
    xj_ref : (1, TM, C)  neighbour features for this k
    wa_ref : (C, OCP)    folded weight  w[:C] - w[C:]
    wb_ref : (C, OCP)    folded weight  w[C:]
    b_ref  : (1, OCP)    bias (f32, zero padded)
    o_ref  : (TM, OCP)   lane-dense output
    acc_ref: (TM, OCP)   f32 scratch, running max_k of xj_k @ wb
    """
    k = pl.program_id(1)
    y = jnp.dot(xj_ref[0], wb_ref[...], preferred_element_type=jnp.float32)

    @pl.when(k == 0)
    def _():
        acc_ref[...] = y

    @pl.when(k > 0)
    def _():
        acc_ref[...] = jnp.maximum(acc_ref[...], y)

    @pl.when(k == pl.num_programs(1) - 1)
    def _():
        c = jnp.dot(xc_ref[...], wa_ref[...],
                    preferred_element_type=jnp.float32)
        o_ref[...] = jnp.maximum(acc_ref[...] + c + b_ref[...],
                                 0.0).astype(o_ref.dtype)


def _edge_conv_packed_kernel(xij_ref, w_ref, b_ref, o_ref, acc_ref):
    """General path: [x_i | x_j] packed on channels, stacked (2C, OCP) weight."""
    k = pl.program_id(1)
    y = jnp.dot(xij_ref[0], w_ref[...], preferred_element_type=jnp.float32)

    @pl.when(k == 0)
    def _():
        acc_ref[...] = y

    @pl.when(k > 0)
    def _():
        acc_ref[...] = jnp.maximum(acc_ref[...], y)

    @pl.when(k == pl.num_programs(1) - 1)
    def _():
        o_ref[...] = jnp.maximum(acc_ref[...] + b_ref[...],
                                 0.0).astype(o_ref.dtype)


# ---------------------------------------------------------------------------
# Wrapper.
# ---------------------------------------------------------------------------
def batched_index_select(x, idx):
    """x: (B, C, Nr, 1), idx: (B, N, K) -> (B, C, N, K) = x[b,c,idx[b,n,k],0]."""
    B, C, Nr, _ = x.shape
    _, N, K = idx.shape
    xs = x[..., 0]
    idx_f = jnp.broadcast_to(idx.reshape(B, 1, N * K), (B, C, N * K))
    return jnp.take_along_axis(xs, idx_f, axis=2).reshape(B, C, N, K)


def edge_conv2d(x, edge_index, w, b, *, tile_rows=1024, compute_dtype=None,
                centers_constant_over_k=None):
    """EdgeConv2d forward.

    x          : (B, C, Nr, 1)
    edge_index : (2, B, N, K) int32 (edge_index[1] = centers, [0] = neighbours)
    w          : (2C, out_C)    (PyTorch conv weight (out_C, 2C, 1, 1) transposed)
    b          : (1, out_C)
    returns    : (B, out_C, N, 1)
    """
    B, C, Nr, _ = x.shape
    _, _, N, K = edge_index.shape
    out_c = w.shape[1]
    # Lane-dense output; fill the 256-wide MXU when out_c > 128 (v6e/v7x).
    out_cp = _round_up(out_c, 256 if out_c > 128 else 128)

    if compute_dtype is None:
        compute_dtype = jnp.bfloat16 if x.dtype == jnp.float32 else x.dtype

    # Fast path valid iff the center index does not depend on k (standard
    # EdgeConv / ViG).  Auto-detect only on concrete (non-traced) indices.
    if centers_constant_over_k is None:
        try:
            centers_constant_over_k = bool(
                jnp.all(edge_index[1] == edge_index[1][..., :1]))
        except Exception:             # traced under jit -> use the safe path
            centers_constant_over_k = False

    # Channels-last, compute-dtype view; cast BEFORE gathering so the
    # K-amplified stream is written/read at the narrow width.
    xs = jnp.squeeze(x, axis=-1).transpose(0, 2, 1).astype(compute_dtype)
    b_ix = jnp.arange(B, dtype=edge_index.dtype)

    def gather_knc(idx):              # (B, N, K) -> (K, B*N, C)
        idx_kbn = idx.transpose(2, 0, 1)                    # cheap (ints)
        return xs[b_ix[None, :, None], idx_kbn].reshape(K, B * N, C)

    # Fold cat([x_i, x_j - x_i]) @ w  ==  x_i @ (w[:C]-w[C:]) + x_j @ w[C:].
    w_a = (w[:C] - w[C:]).astype(jnp.float32)
    w_b = w[C:].astype(jnp.float32)
    bias = b.astype(jnp.float32)
    if out_cp != out_c:
        pad_c = out_cp - out_c
        w_a = jnp.pad(w_a, ((0, 0), (0, pad_c)))
        w_b = jnp.pad(w_b, ((0, 0), (0, pad_c)))
        bias = jnp.pad(bias, ((0, 0), (0, pad_c)))
    w_a = w_a.astype(compute_dtype)
    w_b = w_b.astype(compute_dtype)

    bn = B * N
    in_isz = jnp.dtype(compute_dtype).itemsize
    out_isz = jnp.dtype(x.dtype).itemsize

    # ---- Row-tile size from the VMEM budget (headroom for v7x's 64 MiB). ----
    vmem_cap = _vmem_capacity_bytes()
    budget = int(0.55 * vmem_cap)
    fixed = 2 * (2 * C * out_cp * in_isz) + 2 * out_cp * 4   # dbl-buffered w + bias
    per_row = (2 * (2 * C) * in_isz       # input stream(s), double-buffered
               + 2 * out_cp * out_isz     # output block, double-buffered
               + out_cp * 4)              # f32 accumulator scratch
    tile = max((budget - fixed) // per_row, 8)
    tile = min(tile, int(tile_rows))
    # >= 2 parallel row steps so both v7x TensorCores get work.
    tile = min(tile, _round_up(pl.cdiv(bn, 2), 8))
    tile = max(8, (int(tile) // 8) * 8)

    bn_p = _round_up(bn, tile)
    pad_r = bn_p - bn

    vmem_est = fixed + per_row * tile
    vmem_limit = int(min(max(2 * vmem_est, 16 << 20), int(0.75 * vmem_cap)))

    grid = (bn_p // tile, K)
    cparams = pltpu.CompilerParams(
        dimension_semantics=("parallel", "arbitrary"),
        vmem_limit_bytes=vmem_limit)
    out_shape = jax.ShapeDtypeStruct((bn_p, out_cp), x.dtype)
    out_spec = pl.BlockSpec((tile, out_cp), lambda i, k: (i, 0))
    scratch = [pltpu.VMEM((tile, out_cp), jnp.float32)]

    if centers_constant_over_k:
        # Centers gathered ONCE (no K amplification); neighbours (K, B*N, C).
        idx_c = edge_index[1][..., 0]                        # (B, N)
        x_c = xs[b_ix[:, None], idx_c].reshape(bn, C)
        x_j = gather_knc(edge_index[0])
        if pad_r:
            x_c = jnp.pad(x_c, ((0, pad_r), (0, 0)))
            x_j = jnp.pad(x_j, ((0, 0), (0, pad_r), (0, 0)))
        out = pl.pallas_call(
            _edge_conv_center_kernel,
            out_shape=out_shape,
            grid_spec=pltpu.PrefetchScalarGridSpec(
                num_scalar_prefetch=0,
                grid=grid,
                in_specs=[
                    pl.BlockSpec((tile, C), lambda i, k: (i, 0)),
                    pl.BlockSpec((1, tile, C), lambda i, k: (k, i, 0)),
                    pl.BlockSpec((C, out_cp), lambda i, k: (0, 0)),
                    pl.BlockSpec((C, out_cp), lambda i, k: (0, 0)),
                    pl.BlockSpec((1, out_cp), lambda i, k: (0, 0)),
                ],
                out_specs=out_spec,
                scratch_shapes=scratch),
            compiler_params=cparams,
        )(x_c, x_j, w_a, w_b, bias)
    else:
        # General path: pack [x_i | x_j] on channels -> one deeper matmul per k.
        x_i = gather_knc(edge_index[1])
        x_j = gather_knc(edge_index[0])
        x_ij = jnp.concatenate([x_i, x_j], axis=-1)          # (K, B*N, 2C)
        w_ab = jnp.concatenate([w_a, w_b], axis=0)           # (2C, OCP)
        if pad_r:
            x_ij = jnp.pad(x_ij, ((0, 0), (0, pad_r), (0, 0)))
        out = pl.pallas_call(
            _edge_conv_packed_kernel,
            out_shape=out_shape,
            grid_spec=pltpu.PrefetchScalarGridSpec(
                num_scalar_prefetch=0,
                grid=grid,
                in_specs=[
                    pl.BlockSpec((1, tile, 2 * C), lambda i, k: (k, i, 0)),
                    pl.BlockSpec((2 * C, out_cp), lambda i, k: (0, 0)),
                    pl.BlockSpec((1, out_cp), lambda i, k: (0, 0)),
                ],
                out_specs=out_spec,
                scratch_shapes=scratch),
            compiler_params=cparams,
        )(x_ij, w_ab, bias)

    # (B*N, out_Cp) -> (B, out_C, N, 1) NCHW (kept for module-API parity;
    # consumers that accept channels-last can skip this extra HBM pass).
    out = out[:bn, :out_c].reshape(B, N, out_c)
    return out.transpose(0, 2, 1)[..., None]


def edge_conv2d_ref(x, edge_index, w, b):
    """Pure-JAX reference mirroring the PyTorch forward."""
    x_i = batched_index_select(x, edge_index[1])
    x_j = batched_index_select(x, edge_index[0])
    f = jnp.concatenate([x_i, x_j - x_i], axis=1)            # (B, 2C, N, K)
    y = jnp.einsum("bcnk,co->bonk", f, w) + b[0][None, :, None, None]
    y = jnp.maximum(y, 0.0)
    return jnp.max(y, axis=-1, keepdims=True)                # (B, out_C, N, 1)


if __name__ == "__main__":
    key = jax.random.PRNGKey(0)
    B, C, N, K = 2, 8, 16, 8          # batch, in_channels, num_nodes, neighbours
    out_c = 16                        # out_channels

    k_x, k_e0, k_e1, k_w, k_b = jax.random.split(key, 5)
    x = jax.random.normal(k_x, (B, C, N, 1), dtype=jnp.float32)
    neighbours = jax.random.randint(k_e0, (B, N, K), 0, N, dtype=jnp.int32)
    centers_vig = jnp.broadcast_to(                          # standard ViG centers
        jnp.arange(N, dtype=jnp.int32)[None, :, None], (B, N, K))
    centers_rand = jax.random.randint(k_e1, (B, N, K), 0, N, dtype=jnp.int32)

    # Deterministic parameter init (Conv2d(2C, out_C, 1, bias=True)).
    w_pt = jax.random.normal(k_w, (out_c, 2 * C), dtype=jnp.float32) * 0.1
    b_pt = jax.random.normal(k_b, (out_c,), dtype=jnp.float32) * 0.1
    w = w_pt.T                        # (2C, out_C) for the kernel matmul
    b = b_pt[None, :]                 # (1, out_C)

    # 1) Fast path (centers constant over K), default bf16 compute.
    ei = jnp.stack([neighbours, centers_vig], axis=0)
    out = jax.block_until_ready(edge_conv2d(x, ei, w, b))
    ref = edge_conv2d_ref(x, ei, w, b)
    assert out.shape == (B, out_c, N, 1)
    assert jnp.allclose(out, ref, atol=5e-2, rtol=5e-2)

    # 2) Fast path, explicit f32 compute (tight tolerance, proves exactness).
    out32 = jax.block_until_ready(
        edge_conv2d(x, ei, w, b, compute_dtype=jnp.float32))
    assert jnp.allclose(out32, ref, atol=1e-4, rtol=1e-4)

    # 3) General path (centers vary with k), default bf16 compute.
    ei_g = jnp.stack([neighbours, centers_rand], axis=0)
    out_g = jax.block_until_ready(edge_conv2d(x, ei_g, w, b))
    ref_g = edge_conv2d_ref(x, ei_g, w, b)
    assert jnp.allclose(out_g, ref_g, atol=5e-2, rtol=5e-2)

    print("KERNEL_OK")
</pallas_src>

<mosaic_0001>
module attributes {stable_mosaic.version = 11 : i64} {
  func.func @_edge_conv_center_kernel(%arg0: i32, %arg1: i32, %arg2: memref<16x8xbf16, #tpu.memory_space<vmem>>, %arg3: memref<1x16x8xbf16, #tpu.memory_space<vmem>>, %arg4: memref<8x128xbf16, #tpu.memory_space<vmem>>, %arg5: memref<8x128xbf16, #tpu.memory_space<vmem>>, %arg6: memref<1x128xf32, #tpu.memory_space<vmem>>, %arg7: memref<16x128xf32, #tpu.memory_space<vmem>>, %arg8: memref<16x128xf32, #tpu.memory_space<vmem>>) attributes {dimension_semantics = [#tpu.dimension_semantics<parallel>, #tpu.dimension_semantics<arbitrary>], iteration_bounds = array<i64: 2, 8>, scalar_prefetch = 0 : i64, scratch_operands = 1 : i64, tpu.core_type = #tpu.core_type<tc>, window_params = [{transform_indices = @transform_0, window_bounds = array<i64: 16, 8>}, {transform_indices = @transform_1, window_bounds = array<i64: 1, 16, 8>}, {pipeline_mode = #tpu.pipeline_mode<synchronous>, transform_indices = @transform_2, window_bounds = array<i64: 8, 128>}, {pipeline_mode = #tpu.pipeline_mode<synchronous>, transform_indices = @transform_3, window_bounds = array<i64: 8, 128>}, {pipeline_mode = #tpu.pipeline_mode<synchronous>, transform_indices = @transform_4, window_bounds = array<i64: 1, 128>}, {transform_indices = @transform_5, window_bounds = array<i64: 16, 128>}]} {
    %c0 = arith.constant 0 : index
    %c0_0 = arith.constant 0 : index
    %c0_1 = arith.constant 0 : index
    %0 = vector.load %arg3[%c0, %c0_0, %c0_1] : memref<1x16x8xbf16, #tpu.memory_space<vmem>>, vector<1x16x8xbf16>
    %1 = vector.shape_cast %0 : vector<1x16x8xbf16> to vector<16x8xbf16>
    %c0_2 = arith.constant 0 : index
    %c0_3 = arith.constant 0 : index
    %2 = vector.load %arg5[%c0_2, %c0_3] : memref<8x128xbf16, #tpu.memory_space<vmem>>, vector<8x128xbf16>
    %cst = arith.constant dense<0.000000e+00> : vector<16x128xf32>
    %3 = tpu.matmul %1, %2, %cst {dimension_numbers = #tpu.dot_dimension_numbers<[1], [0], [0], [1], [0, 0, 1, 1], [], []>} : vector<16x8xbf16>, vector<8x128xbf16>, vector<16x128xf32> -> vector<16x128xf32>
    %c0_i32 = arith.constant 0 : i32
    %4 = arith.cmpi eq, %arg1, %c0_i32 : i32
    %5 = arith.extui %4 : i1 to i32
    %c0_i32_4 = arith.constant 0 : i32
    %6 = arith.cmpi ne, %5, %c0_i32_4 : i32
    scf.if %6 {
      %c0_8 = arith.constant 0 : index
      %c0_9 = arith.constant 0 : index
      %13 = vector.load %arg8[%c0_8, %c0_9] : memref<16x128xf32, #tpu.memory_space<vmem>>, vector<16x128xf32>
      tpu.vector_store %arg8[%c0_8, %c0_9], %3 {strides = array<i32>} : memref<16x128xf32, #tpu.memory_space<vmem>>, vector<16x128xf32>,
    } else {
    }
    %c0_i32_5 = arith.constant 0 : i32
    %7 = arith.cmpi sgt, %arg1, %c0_i32_5 : i32
    %8 = arith.extui %7 : i1 to i32
    %c0_i32_6 = arith.constant 0 : i32
    %9 = arith.cmpi ne, %8, %c0_i32_6 : i32
    scf.if %9 {
      %c0_8 = arith.constant 0 : index
      %c0_9 = arith.constant 0 : index
      %13 = vector.load %arg8[%c0_8, %c0_9] : memref<16x128xf32, #tpu.memory_space<vmem>>, vector<16x128xf32>
      %14 = arith.maximumf %13, %3 : vector<16x128xf32>
      %c0_10 = arith.constant 0 : index
      %c0_11 = arith.constant 0 : index
      %15 = vector.load %arg8[%c0_10, %c0_11] : memref<16x128xf32, #tpu.memory_space<vmem>>, vector<16x128xf32>
      tpu.vector_store %arg8[%c0_10, %c0_11], %14 {strides = array<i32>} : memref<16x128xf32, #tpu.memory_space<vmem>>, vector<16x128xf32>,
    } else {
    }
    %c7_i32 = arith.constant 7 : i32
    %10 = arith.cmpi eq, %arg1, %c7_i32 : i32
    %11 = arith.extui %10 : i1 to i32
    %c0_i32_7 = arith.constant 0 : i32
    %12 = arith.cmpi ne, %11, %c0_i32_7 : i32
    scf.if %12 {
      %c0_8 = arith.constant 0 : index
      %c0_9 = arith.constant 0 : index
      %13 = vector.load %arg2[%c0_8, %c0_9] : memref<16x8xbf16, #tpu.memory_space<vmem>>, vector<16x8xbf16>
      %c0_10 = arith.constant 0 : index
      %c0_11 = arith.constant 0 : index
      %14 = vector.load %arg4[%c0_10, %c0_11] : memref<8x128xbf16, #tpu.memory_space<vmem>>, vector<8x128xbf16>
      %cst_12 = arith.constant dense<0.000000e+00> : vector<16x128xf32>
      %15 = tpu.matmul %13, %14, %cst_12 {dimension_numbers = #tpu.dot_dimension_numbers<[1], [0], [0], [1], [0, 0, 1, 1], [], []>} : vector<16x8xbf16>, vector<8x128xbf16>, vector<16x128xf32> -> vector<16x128xf32>
      %c0_13 = arith.constant 0 : index
      %c0_14 = arith.constant 0 : index
      %16 = vector.load %arg8[%c0_13, %c0_14] : memref<16x128xf32, #tpu.memory_space<vmem>>, vector<16x128xf32>
      %17 = arith.addf %16, %15 : vector<16x128xf32>
      %c0_15 = arith.constant 0 : index
      %c0_16 = arith.constant 0 : index
      %18 = vector.load %arg6[%c0_15, %c0_16] : memref<1x128xf32, #tpu.memory_space<vmem>>, vector<1x128xf32>
      %19 = vector.broadcast %18 : vector<1x128xf32> to vector<16x128xf32>
      %20 = arith.addf %17, %19 : vector<16x128xf32>
      %cst_17 = arith.constant 0.000000e+00 : f32
      %21 = vector.broadcast %cst_17 : f32 to vector<16x128xf32>
      %22 = arith.maximumf %20, %21 : vector<16x128xf32>
      %c0_18 = arith.constant 0 : index
      %c0_19 = arith.constant 0 : index
      %23 = vector.load %arg7[%c0_18, %c0_19] : memref<16x128xf32, #tpu.memory_space<vmem>>, vector<16x128xf32>
      tpu.vector_store %arg7[%c0_18, %c0_19], %22 {strides = array<i32>} : memref<16x128xf32, #tpu.memory_space<vmem>>, vector<16x128xf32>,
    } else {
    }
    return
  }
  func.func @transform_0(%arg0: i32, %arg1: i32) -> (i32, i32) {
    %c0_i32 = arith.constant 0 : i32
    %c0_i32_0 = arith.constant 0 : i32
    return %arg0, %c0_i32 : i32, i32
  }
  func.func @transform_1(%arg0: i32, %arg1: i32) -> (i32, i32, i32) {
    %c0_i32 = arith.constant 0 : i32
    %c0_i32_0 = arith.constant 0 : i32
    return %arg1, %arg0, %c0_i32 : i32, i32, i32
  }
  func.func @transform_2(%arg0: i32, %arg1: i32) -> (i32, i32) {
    %c0_i32 = arith.constant 0 : i32
    %c0_i32_0 = arith.constant 0 : i32
    %c0_i32_1 = arith.constant 0 : i32
    return %c0_i32, %c0_i32_0 : i32, i32
  }
  func.func @transform_3(%arg0: i32, %arg1: i32) -> (i32, i32) {
    %c0_i32 = arith.constant 0 : i32
    %c0_i32_0 = arith.constant 0 : i32
    %c0_i32_1 = arith.constant 0 : i32
    return %c0_i32, %c0_i32_0 : i32, i32
  }
  func.func @transform_4(%arg0: i32, %arg1: i32) -> (i32, i32) {
    %c0_i32 = arith.constant 0 : i32
    %c0_i32_0 = arith.constant 0 : i32
    %c0_i32_1 = arith.constant 0 : i32
    return %c0_i32, %c0_i32_0 : i32, i32
  }
  func.func @transform_5(%arg0: i32, %arg1: i32) -> (i32, i32) {
    %c0_i32 = arith.constant 0 : i32
    %c0_i32_0 = arith.constant 0 : i32
    return %arg0, %c0_i32 : i32, i32
  }
}

</mosaic_0001>

<bundles_post_ra>
// kernel: tpu_custom_call.1
= control target key start
LH: loop header
LB: loop body
LE: loop exit
PB: predicated region body
PF: predicated region fallthrough
CT: control target
= control target key end

     0   :  { %s854_s0 = inlined_call_operand.vmem [shape: bf16[32,8], index: 0, kind: input, shape index: {}]   ;;  %s855_s1 = inlined_call_operand.vmem [shape: bf16[8,32,8], index: 1, kind: input, shape index: {}]   ;;  %s856_s2 = inlined_call_operand.vmem [shape: bf16[8,128], index: 2, kind: input, shape index: {}]   ;;  %s857_s3 = inlined_call_operand.vmem [shape: bf16[8,128], index: 3, kind: input, shape index: {}]   ;;  %s858_s4 = inlined_call_operand.vmem [shape: f32[1,128], index: 4, kind: input, shape index: {}]   ;;  %s859_s5 = inlined_call_operand.hbm [shape: f32[32,128], index: 5, kind: output, shape index: {}]  }
   0x1   :  { %862 = sst [smem:[#allocation7_spill]] %s857_s3 }
   0x2   :  { %10 = vsyncpa [#allocation4], 0 }
   0x3   :  { %12 = vsyncpa [#allocation4 + $0x1], 0  ;;  %s708_s18 = smov 0   ;;  %s710_s19 = smov 0  }
   0x4   :  { %s712_s20 = smov 0   ;;  %s714_s21 = smov 0  }
   0x5   :  { %s716_s22 = smov 0   ;;  %s718_s23 = smov 0  }
   0x6   :  { %s720_s24 = smov 0   ;;  %s722_s25 = smov 0  }
   0x7 LB: > { %s474_s26 = sadd.s32 4294967295, %s674_s25   ;;  %s475_s27 = sadd.s32 4294967294, %s674_s25   ;;  %s674_s25 = sphi %s722_s25, %s18_s25   ;;  %s670_s24 = sphi %s720_s24, %s875_s24   ;;  %s666_s23 = sphi %s718_s23, %s874_s23   ;;  %s662_s22 = sphi %s716_s22, %s873_s22   ;;  %s658_s21 = sphi %s714_s21, %s872_s21   ;;  %s654_s20 = sphi %s712_s20, %s871_s20   ;;  %s650_s19 = sphi %s710_s19, %s870_s19   ;;  %s646_s18 = sphi %s708_s18, %s869_s18  }
   0x8   : > { %s27_s28 = sadd.s32 1, %s666_s23  ;;  %s30_s29 = sadd.s32 1, %s670_s24 }
   0x9   : > { %p28_p0 = scmp.ge.s32.totalorder %s27_s28, 8  ;;  %p164_p1 = scmp.ne.s32.totalorder %s654_s20, %s650_s19 }
   0xa   : > { %p165_p2 = scmp.eq.s32.totalorder %s474_s26, 15  ;;  %p170_p4 = scmp.ne.s32.totalorder %s650_s19, %s646_s18 }
   0xb   : > { %s877_s28 = smov (%p28_p0, %s27_s28), 0  ;;  %s879_s29 = smov (!%p28_p0, %s30_s29), %s670_s24 }
   0xc   : > { %p757_p3 = por %p165_p2, %p164_p1  ;;  %p32_p5 = scmp.ge.s32.totalorder %s879_s29, 2 }
   0xd   : > { %p171_p6 = scmp.eq.s32.totalorder %s475_s27, 15  ;;  %p478_p7 = scmp.ge.s32.totalorder %s674_s25, 1 }
   0xe   : > { %p220_p8 = scmp.lt.s32.totalorder %s674_s25, 17  ;;  %s881_s29 = smov (%p32_p5, %s879_s29), 0 }
   0xf   : > { %864 = sst [smem:[#allocation6_spill]] %s881_s29  ;;  %p767_p9 = por %p171_p6, %p170_p4 }
  0x10   : > { %p221_p10 = pnand %p478_p7, %p220_p8  ;;  %s151_s7 = ssub.s32 %s670_s24, %s881_s29 }
  0x11   : > { %s154_s8 = sadd.s32 1, %s654_s20  ;;  %p152_p11 = scmp.eq.s32.totalorder %s151_s7, 0 }
  0x12   : > { %224 = sbr.rel (%p221_p10) target bundleno = 348 (0x15c), region = 40  ;;  %s861_s10 = sand.u32 (!%p221_p10), 1, %s650_s19  }
  0x13   : > { %s775_s9 = scalar_select %p152_p11, %s654_s20, %s154_s8  }
  0x14   : > { %s866_s3 = sld [smem:[#allocation7_spill]] (!%p221_p10)  ;;  %s480_s13 = sshll.u32 (!%p221_p10), %s662_s22, 1 }
  0x15   : > { %s479_s14 = sshll.u32 (!%p221_p10), %s861_s10, 4  ;;  %p258_p12 = scmp.lt.s32.totalorder (!%p221_p10), %s480_s13, 3 }
  0x16   : > { %p264_p13 = scmp.lt.s32.totalorder (!%p221_p10), %s658_s21, 7  ;;  %s794_s10 = scalar_lea.vmem (!%p221_p10), [#allocation3], %s479_s14 }
  0x17   : > { %vm287_vm0 = vcmask 1043456   ;;  %s883_s13 = smov (!%p258_p12, %s480_s13), 3  ;;  %vm283_vm1 = vcmask 64512   ;;  %p490_p0 = scmp.ne.s32.totalorder %s658_s21, 0 }
  0x18   : > { %s265_s15 = scalar_select %p264_p13, %s658_s21, 7 }
  0x19   : > { %s481_s16 = sshll.u32 %s883_s13, 2 }
  0x1a   : > { %v277_v0 = vld [vmem:[%s866_s3] sm:$0xf]  ;;  %s261_s27 = scalar_lea.vmem %s854_s0, %s481_s16  ;;  %s483_s7 = sshll.u32 %s265_s15, 2 }
  0x1b   : > { %v289_v1 = vsel %vm287_vm0, %v277_v0, 0  ;;  %s269_s8 = sadd.s32 %s483_s7, %s883_s13 }
  0x1c   : > { %298 = vmatpush.bf16.msra.mxu0 %v289_v1  ;;  %s484_s11 = sshll.u32 %s269_s8, 2 }
  0x1d   : > { %s271_s29 = scalar_lea.vmem %s855_s1, %s484_s11 }
  0x1e   : > { %v503_v2 = vld [vmem:[%s271_s29] sm:$0xff] }
  0x1f   : > { %489 = vmatmul.msk.bf16.vlgmr.msra.gmra.mxu0 %vm283_vm1, %v503_v2 }
  0x9c   : > { %v300_v3 = vpop.f32.mrf.mxu0 }
  0xa0   : > { %308 = sbr.rel (%p490_p0) target bundleno = 167 (0xa7), region = 44 }
  0xa4   : > { %v302_v4 = vpop.f32.mrf.mxu0 }
  0xa5   : > { %309 = vst [vmem:[#allocation2] sm:$0xff] %v300_v3 }
  0xa6   : > { %310 = vst [vmem:[#allocation2 + $0x8] sm:$0xff] %v302_v4 }
  0xa7 PF: > { %p491_p1 = scmp.le.s32.totalorder %s658_s21, 0 }
  0xa9   : > { %314 = sbr.rel (%p491_p1) target bundleno = 179 (0xb3), region = 48 }
  0xae   : > { %v315_v5 = vld [vmem:[#allocation2] sm:$0xff]  ;;  %v316_v6 = vld [vmem:[#allocation2 + $0x8] sm:$0xff] }
  0xaf   : > { %v317_v7 = vmax.f32 %v315_v5, %v300_v3  ;;  %v318_v8 = vmax.f32 %v316_v6, %v302_v4 }
  0xb1   : > { %319 = vst [vmem:[#allocation2] sm:$0xff] %v317_v7 }
  0xb2   : > { %320 = vst [vmem:[#allocation2 + $0x8] sm:$0xff] %v318_v8 }
  0xb3 PF: > { %p492_p2 = scmp.ne.s32.totalorder %s658_s21, 7 }
  0xb5   : > { %324 = sbr.rel (%p492_p2) target bundleno = 332 (0x14c), region = 52 }
  0xba   : > { %v327_v9 = vld [vmem:[%s856_s2] sm:$0xf]  ;;  %v354_v18 = vld [vmem:[#allocation2 + $0x8] sm:$0xff] }
  0xbb   : > { %v337_v10 = vsel %vm287_vm0, %v327_v9, 0  ;;  %v504_v11 = vld [vmem:[%s261_s27] sm:$0xff] }
  0xbc   : > { %346 = vmatpush.bf16.msra.mxu0 %v337_v10  ;;  %v353_v12 = vld [vmem:[#allocation2] sm:$0xff] }
  0xbd   : > { %v579_v13 = vld [vmem:[%s858_s4] ss:$0 sm:$0xff] }
  0xbf   : > { %497 = vmatmul.msk.bf16.vlgmr.msra.gmra.mxu0 %vm283_vm1, %v504_v11 }
 0x13c   : > { %v348_v14 = vpop.f32.mrf.mxu0 }
 0x13d   : > { %v355_v15 = vadd.f32 %v353_v12, %v348_v14 }
 0x13f   : > { %v361_v16 = vadd.f32 %v579_v13, %v355_v15 }
 0x141   : > { %v363_v17 = vmax.f32 %v361_v16, 0.0 }
 0x143   : > { %365 = vst [vmem:[%s794_s10] sm:$0xff] %v363_v17 }
 0x144   : > { %v350_v19 = vpop.f32.mrf.mxu0 }
 0x145   : > { %v356_v20 = vadd.f32 %v354_v18, %v350_v19 }
 0x147   : > { %v362_v21 = vadd.f32 %v579_v13, %v356_v20 }
 0x149   : > { %v364_v22 = vmax.f32 %v362_v21, 0.0 }
 0x14b   : > { %366 = vst [vmem:[%s794_s10 + $0x8] sm:$0xff] %v364_v22 }
 0x14c PF: > { %s505_s21 = sshll.u32 %s662_s22, 4  ;;  %s380_s26 = sshll.u32 %s794_s10, 4  ;;  %s381_s26 = int_to_ptr.vmem [resolvable:$true] %s380_s26 }
 0x14d   : > { %s379_s17 = scalar_lea.hbm %s859_s5, %s505_s21  ;;  %s867_s7 = sand.u32 1, %s650_s19  }
 0x14e   : > { %s382_s27 = sshll.u32 %s379_s17, 4  ;;  %s368_s8 = scalar_lea.sflag [#allocation4], %s867_s7  ;;  %s383_s27 = int_to_ptr.hbm [resolvable:$true] %s382_s27 }
 0x14f   : > { %s594_s11 = sshra.s32 %s383_s27, 4  ;;  %s600_s22 = scalar_lea.hbm %s859_s5, 32  ;;  %s595_s11 = int_to_ptr.hbm [resolvable:$true] %s594_s11 }
 0x150   : > { %s596_s12 = scalar_lea.hbm %s595_s11, 16  ;;  %p601_p7 = scmp.lt.s32.totalorder %s595_s11, %s859_s5 }
 0x151   : > { %p597_p4 = scmp.ne.s32.totalorder %s595_s11, %s596_s12  ;;  %p602_p8 = scmp.lt.s32.totalorder %s600_s22, %s596_s12 }
 0x153   : > { %p598_p5 = pnand %p597_p4, %p757_p3  ;;  %p603_p10 = por %p602_p8, %p601_p7 }
 0x155   : > { %p599_p6 = pneg %p598_p5 }
 0x157   : > { %p604_p11 = pnand %p603_p10, %p599_p6 }
 0x159   : > { %607 = shalt.err (!%p604_p11)
}
 0x15a   : > { %s676_s10 = smov 128   ;;  %s677_s21 = smov 8  }
 0x15b   : > { %506 = dma.vmem_to_hbm [thread:$0]  (%p757_p3), %s381_s26, 256, %s383_s27, %s368_s8, %s676_s10, %s676_s10, %s677_s21  }
 0x15c PF: > { %p512_p12 = scmp.ge.s32.totalorder %s674_s25, 2  ;;  %s397_s15 = sand.u32 1, %s646_s18  }
 0x15d   : > { %s398_s16 = scalar_lea.sflag [#allocation4], %s397_s15 }
 0x15e   : > { %p509_p13 = pnand %p512_p12, %p767_p9 }
 0x160   : > { %p510_p0 = pneg %p509_p13 }
 0x162   : > { %641 = dma.done.wait (%p510_p0), %s398_s16, 256  }
 0x163   : > { %643 = vsyncadd (%p510_p0), %s398_s16, 4294967040  ;;  %s18_s25 = sadd.s32 1, %s674_s25   ;;  %s868_s30 = sld [smem:[#allocation6_spill]] }
 0x164   : > { %p15_p1 = scmp.ge.s32.totalorder %s18_s25, 18   ;;  %s869_s18 = smov %s650_s19 }
 0x165   : > { %s870_s19 = smov %s654_s20  ;;  %s871_s20 = smov %s775_s9 }
 0x166   : > { %s872_s21 = smov %s666_s23  ;;  %s873_s22 = smov %s670_s24 }
 0x167   : > { %s874_s23 = smov %s877_s28  ;;  %17 = sbr.rel (!%p15_p1) target bundleno = 7 (0x7), region = 90 }
 0x169   : > { %s875_s24 = smov %s868_s30 }
 0x16c   :  { %404 = vsyncpa [#allocation4], 1 }
 0x16d   :  { %406 = vsyncpa [#allocation4 + $0x1], 1 }

</bundles_post_ra>
